<compile_context>
chip_gen: v6e
topology: v6e:2x2x1
jax: 0.10.0
libtpu: 0.0.40
codegen_flags: <defaults>
</compile_context>

<pallas_src>
import functools

import jax
import jax.numpy as jnp
from jax.experimental import pallas as pl
from jax.experimental.pallas import tpu as pltpu


def _row_loss(x, y):
    """Per-row KD loss for a (TB, C) tile.  Returns (TB, 1) float32."""
    # Max/subtract in the native dtype, cast lazily -> fewer live f32 temps.
    x_sh = (x - jnp.max(x, axis=-1, keepdims=True)).astype(jnp.float32)
    ey = jnp.exp((y - jnp.max(y, axis=-1, keepdims=True)).astype(jnp.float32))
    # log_softmax(x) = x_sh - lse_x  (numerically stable)
    lse_x = jnp.log(jnp.sum(jnp.exp(x_sh), axis=-1, keepdims=True))
    sum_ey = jnp.sum(ey, axis=-1, keepdims=True)
    # sum(py * log_px) = sum(ey * x_sh) / sum(ey) - lse_x    (since sum(py)==1)
    wsum = jnp.sum(ey * x_sh, axis=-1, keepdims=True)
    return wsum / sum_ey - lse_x


def _kd_kernel_none(x_ref, y_ref, loss_ref):
    loss_ref[...] = _row_loss(x_ref[...], y_ref[...]).astype(loss_ref.dtype)


def _kd_kernel_partial(x_ref, y_ref, psum_ref, *, tb, n_rows):
    """Per-tile partial sum of row losses (ragged-tail rows masked to zero)."""
    i = pl.program_id(0)
    loss = _row_loss(x_ref[...], y_ref[...])                        # (tb, 1)
    row_ids = i * tb + jax.lax.broadcasted_iota(jnp.int32, (tb, 1), 0)
    loss = jnp.where(row_ids < n_rows, loss, 0.0)
    psum_ref[0] = jnp.sum(loss, axis=0, keepdims=True)              # (1, 1)


def _vmem_budgets():
    """(per-tile VMEM target, vmem_limit cap) sized per TPU generation."""
    cap = None
    try:
        cap = getattr(pltpu.get_tpu_info(), "vmem_capacity_bytes", None)
    except Exception:
        cap = None
    if cap is None:
        cap = 64 << 20                      # assume the smallest (v7x)
    if cap >= (96 << 20):                   # v5e / v6e: 128 MiB physical VMEM
        return 32 << 20, 48 << 20
    return 16 << 20, 40 << 20               # v7x: 64 MiB physical VMEM


def _pick_tile_rows(n_rows, C, itemsize, tile_target):
    """Row-tile size from the VMEM budget; returns (tb, sublane multiple)."""
    if itemsize >= 4:
        mult = 8
    elif itemsize == 2:
        mult = 16
    else:
        mult = 32
    # 2 inputs x 2 pipeline buffers (native dtype) + ~4 f32 full-tile temps.
    bytes_per_row = 4 * C * itemsize + 4 * C * 4
    tb = tile_target // bytes_per_row
    tb = max(mult, min(tb, 4096))
    tb = (tb // mult) * mult
    if n_rows > mult:
        # Guarantee >= 2 grid steps so both v7x TensorCores get work.
        half = pl.cdiv(pl.cdiv(n_rows, 2), mult) * mult
        tb = min(tb, half)
    if tb >= n_rows:
        tb = n_rows                         # single full-extent block (legal)
    return tb, mult


def kd_cross_entropy_loss(x, y, reduction="mean", *, tile_rows=None):
    """Pallas implementation of KDCrossEntropyLoss.forward(x, y)."""
    assert reduction in ("none", "mean", "sum")
    assert x.shape == y.shape
    *lead, C = x.shape
    n_rows = 1
    for d in lead:
        n_rows *= d
    x2 = x.reshape(n_rows, C)
    y2 = y.reshape(n_rows, C)

    itemsize = jnp.dtype(x.dtype).itemsize
    tile_target, vmem_cap = _vmem_budgets()
    if tile_rows is not None:
        tb, mult = int(tile_rows), 8
    else:
        tb, mult = _pick_tile_rows(n_rows, C, itemsize, tile_target)
    n_tiles = pl.cdiv(n_rows, tb)           # ragged last block; no padding

    # Deeper input pipelining only when tb collapsed to the sublane floor
    # (vocab-scale C) and there are enough steps to overlap.
    deep_pipeline = (tb <= 4 * mult) and (n_tiles >= 4)
    n_in_bufs = 3 if deep_pipeline else 2

    def _in_spec():
        if deep_pipeline:
            return pl.BlockSpec((tb, C), lambda i: (i, 0),
                                pipeline_mode=pl.Buffered(3))
        return pl.BlockSpec((tb, C), lambda i: (i, 0))

    in_specs = [_in_spec(), _in_spec()]

    vmem_need = 2 * n_in_bufs * tb * C * itemsize   # both inputs, pipelined
    vmem_need += 4 * tb * C * 4                     # f32 temporaries
    vmem_need += 4 << 20                            # outputs + slack
    compiler_params = pltpu.CompilerParams(
        dimension_semantics=("parallel",),
        vmem_limit_bytes=int(min(max(vmem_need, 16 << 20), vmem_cap)),
    )

    if reduction == "none":
        out = pl.pallas_call(
            _kd_kernel_none,
            out_shape=jax.ShapeDtypeStruct((n_rows, 1), jnp.float32),
            grid_spec=pltpu.PrefetchScalarGridSpec(
                num_scalar_prefetch=0,
                grid=(n_tiles,),
                in_specs=in_specs,
                out_specs=pl.BlockSpec((tb, 1), lambda i: (i, 0)),
            ),
            compiler_params=compiler_params,
        )(x2, y2)
        # NOTE: returns float32 (PyTorch would return the input dtype).
        return out[:, 0].reshape(tuple(lead))

    kernel = functools.partial(_kd_kernel_partial, tb=tb, n_rows=n_rows)
    partials = pl.pallas_call(
        kernel,
        out_shape=jax.ShapeDtypeStruct((n_tiles, 1, 1), jnp.float32),
        grid_spec=pltpu.PrefetchScalarGridSpec(
            num_scalar_prefetch=0,
            grid=(n_tiles,),
            in_specs=in_specs,
            out_specs=pl.BlockSpec((1, 1, 1), lambda i: (i, 0, 0)),
        ),
        compiler_params=compiler_params,
    )(x2, y2)
    total = jnp.sum(partials)
    if reduction == "mean":
        total = total / jnp.float32(n_rows)
    return total.reshape(())


def _reference(x, y, reduction):
    py = jax.nn.softmax(y, axis=-1)
    px = jax.nn.softmax(x, axis=-1)
    loss = jnp.sum(py * jnp.log(px), axis=-1)
    if reduction == "none":
        return loss
    if reduction == "mean":
        return jnp.mean(loss)
    return jnp.sum(loss)


if __name__ == "__main__":
    key = jax.random.PRNGKey(0)
    kx, ky = jax.random.split(key)

    ok = True
    # Class/softmax axis last.  (3, 5, 128) exercises the ragged-last-block
    # (no-padding) path; (2, 7, 200) additionally uses a non-128-multiple C.
    for shape in ((2, 8, 128), (3, 5, 128), (2, 7, 200)):
        x = jax.random.normal(kx, shape, dtype=jnp.float32)
        y = jax.random.normal(ky, shape, dtype=jnp.float32)
        for reduction in ("none", "mean", "sum"):
            out = kd_cross_entropy_loss(x, y, reduction)
            jax.block_until_ready(out)
            ref = _reference(x, y, reduction)
            if not jnp.allclose(out, ref, atol=1e-4, rtol=1e-4):
                ok = False
                print(f"MISMATCH for shape={shape} reduction={reduction}")

    if ok:
        print("KERNEL_OK")
</pallas_src>

<mosaic_0001>
module attributes {stable_mosaic.version = 11 : i64} {
  func.func @_kd_kernel_none(%arg0: i32, %arg1: memref<8x128xf32, #tpu.memory_space<vmem>>, %arg2: memref<8x128xf32, #tpu.memory_space<vmem>>, %arg3: memref<8x1xf32, #tpu.memory_space<vmem>>) attributes {dimension_semantics = [#tpu.dimension_semantics<parallel>], iteration_bounds = array<i64: 2>, scalar_prefetch = 0 : i64, scratch_operands = 0 : i64, tpu.core_type = #tpu.core_type<tc>, window_params = [{transform_indices = @transform_0, window_bounds = array<i64: 8, 128>}, {transform_indices = @transform_1, window_bounds = array<i64: 8, 128>}, {transform_indices = @transform_2, window_bounds = array<i64: 8, 1>}]} {
    %c0 = arith.constant 0 : index
    %c0_0 = arith.constant 0 : index
    %0 = vector.load %arg1[%c0, %c0_0] : memref<8x128xf32, #tpu.memory_space<vmem>>, vector<8x128xf32>
    %c0_1 = arith.constant 0 : index
    %c0_2 = arith.constant 0 : index
    %1 = vector.load %arg2[%c0_1, %c0_2] : memref<8x128xf32, #tpu.memory_space<vmem>>, vector<8x128xf32>
    %cst = arith.constant dense<0xFF800000> : vector<8xf32>
    %2 = vector.multi_reduction <maximumf>, %0, %cst [1] : vector<8x128xf32> to vector<8xf32>
    %3 = vector.shape_cast %2 : vector<8xf32> to vector<8x1xf32>
    %4 = vector.broadcast %3 : vector<8x1xf32> to vector<8x128xf32>
    %5 = arith.subf %0, %4 : vector<8x128xf32>
    %cst_3 = arith.constant dense<0xFF800000> : vector<8xf32>
    %6 = vector.multi_reduction <maximumf>, %1, %cst_3 [1] : vector<8x128xf32> to vector<8xf32>
    %7 = vector.shape_cast %6 : vector<8xf32> to vector<8x1xf32>
    %8 = vector.broadcast %7 : vector<8x1xf32> to vector<8x128xf32>
    %9 = arith.subf %1, %8 : vector<8x128xf32>
    %10 = math.exp %9 : vector<8x128xf32>
    %11 = math.exp %5 : vector<8x128xf32>
    %cst_4 = arith.constant dense<0.000000e+00> : vector<8xf32>
    %12 = vector.multi_reduction <add>, %11, %cst_4 [1] : vector<8x128xf32> to vector<8xf32>
    %13 = vector.shape_cast %12 : vector<8xf32> to vector<8x1xf32>
    %14 = math.log %13 : vector<8x1xf32>
    %cst_5 = arith.constant dense<0.000000e+00> : vector<8xf32>
    %15 = vector.multi_reduction <add>, %10, %cst_5 [1] : vector<8x128xf32> to vector<8xf32>
    %16 = vector.shape_cast %15 : vector<8xf32> to vector<8x1xf32>
    %17 = arith.mulf %10, %5 : vector<8x128xf32>
    %cst_6 = arith.constant dense<0.000000e+00> : vector<8xf32>
    %18 = vector.multi_reduction <add>, %17, %cst_6 [1] : vector<8x128xf32> to vector<8xf32>
    %19 = vector.shape_cast %18 : vector<8xf32> to vector<8x1xf32>
    %20 = arith.divf %19, %16 : vector<8x1xf32>
    %21 = arith.subf %20, %14 : vector<8x1xf32>
    %c0_7 = arith.constant 0 : index
    %c0_8 = arith.constant 0 : index
    %22 = vector.load %arg3[%c0_7, %c0_8] : memref<8x1xf32, #tpu.memory_space<vmem>>, vector<8x1xf32>
    tpu.vector_store %arg3[%c0_7, %c0_8], %21 {strides = array<i32>} : memref<8x1xf32, #tpu.memory_space<vmem>>, vector<8x1xf32>,
    return
  }
  func.func @transform_0(%arg0: i32) -> (i32, i32) {
    %c0_i32 = arith.constant 0 : i32
    %c0_i32_0 = arith.constant 0 : i32
    return %arg0, %c0_i32 : i32, i32
  }
  func.func @transform_1(%arg0: i32) -> (i32, i32) {
    %c0_i32 = arith.constant 0 : i32
    %c0_i32_0 = arith.constant 0 : i32
    return %arg0, %c0_i32 : i32, i32
  }
  func.func @transform_2(%arg0: i32) -> (i32, i32) {
    %c0_i32 = arith.constant 0 : i32
    %c0_i32_0 = arith.constant 0 : i32
    return %arg0, %c0_i32 : i32, i32
  }
}

</mosaic_0001>

<bundles_post_ra>
// kernel: tpu_custom_call.1
= control target key start
LH: loop header
LB: loop body
LE: loop exit
PB: predicated region body
PF: predicated region fallthrough
CT: control target
= control target key end

     0   :  { %7 = vsyncpa [#allocation3], 0  ;;  %s640_s0 = inlined_call_operand.hbm [shape: f32[16,128], index: 0, kind: input, shape index: {}]   ;;  %s641_s1 = inlined_call_operand.hbm [shape: f32[16,128], index: 1, kind: input, shape index: {}]   ;;  %s642_s2 = inlined_call_operand.vmem [shape: f32[16,1], index: 2, kind: output, shape index: {}]  }
   0x1   :  { %9 = vsyncpa [#allocation3 + $0x1], 0 }
   0x2   :  { %10 = vsyncpa [#allocation5], 0 }
   0x3   :  { %12 = vsyncpa [#allocation5 + $0x1], 0  ;;  %s488_s9 = smov 0   ;;  %s490_s10 = smov 0  }
   0x4   :  { %s492_s11 = smov 0   ;;  %s494_s12 = smov 0  }
   0x5 LB: > { %s507_s13 = sadd.s32 4294967295, %s469_s12   ;;  %s510_s14 = sadd.s32 1, %s469_s12   ;;  %s469_s12 = sphi %s494_s12, %s654_s12   ;;  %s465_s11 = sphi %s492_s11, %s653_s11   ;;  %s461_s10 = sphi %s490_s10, %s652_s10   ;;  %s457_s9 = sphi %s488_s9, %s651_s9  }
   0x6   : > { %s22_s15 = ssub.s32 %s469_s12, %s510_s14  ;;  %s25_s16 = sadd.s32 1, %s465_s11 }
   0x7   : > { %p23_p0 = scmp.eq.s32.totalorder %s22_s15, 0  ;;  %p32_p1 = scmp.ne.s32.totalorder %s465_s11, %s461_s10 }
   0x8   : > { %p33_p2 = scmp.eq.s32.totalorder %s469_s12, 0  ;;  %p38_p3 = scmp.ne.s32.totalorder %s461_s10, %s457_s9 }
   0x9   : > { %s520_s17 = scalar_select %p23_p0, %s465_s11, %s25_s16  }
   0xa   : > { %p34_p4 = por %p33_p2, %p32_p1  ;;  %p39_p5 = scmp.eq.s32.totalorder %s507_s13, 0 }
   0xb   : > { %p334_p6 = scmp.lt.s32.totalorder %s469_s12, 2  ;;  %s529_s19 = sand.u32 1, %s465_s11  }
   0xc   : > { %p524_p7 = por %p39_p5, %p38_p3  ;;  %s313_s20 = sshll.u32 %s529_s19, 3 }
   0xd   : > { %s314_s21 = sshll.u32 %s469_s12, 7  ;;  %s118_s25 = scalar_lea.vmem [#allocation2], %s313_s20 }
   0xe   : > { %s644_s18 = scalar_select %p524_p7, 1, 0 }
   0xf   : > { %s538_s24 = scalar_lea.hbm %s640_s0, %s314_s21  ;;  %s125_s26 = sshll.u32 %s118_s25, 4  ;;  %s542_s26 = int_to_ptr.vmem [resolvable:$true] %s125_s26 }
  0x10   : > { %p544_p8 = pnand %p334_p6, %p34_p4  ;;  %s115_s28 = scalar_lea.sflag [#allocation3], %s529_s19 }
  0x11   : > { %s375_s29 = scalar_lea.hbm %s538_s24, 128  ;;  %s380_s4 = scalar_lea.hbm %s640_s0, 256 }
  0x12   : > { %p376_p11 = scmp.ne.s32.totalorder %s538_s24, %s375_s29  ;;  %p377_p12 = pneg %p544_p8 }
  0x13   : > { %p381_p1 = scmp.lt.s32.totalorder %s538_s24, %s640_s0  ;;  %p382_p2 = scmp.lt.s32.totalorder %s380_s4, %s375_s29 }
  0x14   : > { %p378_p13 = pnand %p377_p12, %p376_p11 }
  0x15   : > { %p383_p3 = por %p382_p2, %p381_p1 }
  0x16   : > { %p379_p0 = pneg %p378_p13 }
  0x18   : > { %p384_p4 = pnand %p383_p3, %p379_p0 }
  0x1a   : > { %387 = shalt.err (!%p384_p4)
}
  0x1b   : > { %s388_s7 = scalar_lea.vmem %s542_s26, 128  ;;  %s471_s8 = smov [#allocation2]  }
  0x1c   : > { %p389_p5 = scmp.ne.s32.totalorder %s542_s26, %s388_s7  ;;  %s393_s9 = sshll.u32 %s471_s8, 4  ;;  %s394_s9 = int_to_ptr.vmem [resolvable:$false] %s393_s9 }
  0x1d   : > { %s395_s15 = scalar_lea.vmem %s394_s9, 256  ;;  %p396_p13 = scmp.lt.s32.totalorder %s542_s26, %s394_s9 }
  0x1e   : > { %p391_p6 = pnand %p389_p5, %p377_p12  ;;  %p397_p9 = scmp.lt.s32.totalorder %s395_s15, %s388_s7 }
  0x20   : > { %p392_p11 = pneg %p391_p6  ;;  %p398_p10 = por %p397_p9, %p396_p13 }
  0x22   : > { %p399_p1 = pnand %p398_p10, %p392_p11 }
  0x24   : > { %402 = shalt.err (!%p399_p1)
}
  0x25   : > { %330 = dma.hbm_to_vmem [thread:$0]  (!%p544_p8), %s538_s24, 128, %s542_s26, %s115_s28  }
  0x26   : > { %p646_p0 = scmp.lt.s32.totalorder %s469_s12, 3  ;;  %p647_p2 = scmp.ge.s32.totalorder %s469_s12, 1 }
  0x27   : > { %s588_s25 = scalar_lea.hbm %s641_s1, %s314_s21  ;;  %s136_s29 = scalar_lea.vmem [#allocation4], %s313_s20 }
  0x28   : > { %p579_p3 = pnand %p647_p2, %p646_p0  ;;  %s143_s30 = sshll.u32 %s136_s29, 4  ;;  %s144_s30 = int_to_ptr.vmem [resolvable:$true] %s143_s30 }
  0x29   : > { %s133_s24 = scalar_lea.sflag [#allocation5], %s529_s19  ;;  %s403_s26 = scalar_lea.hbm %s588_s25, 128 }
  0x2a   : > { %s648_s16 = scalar_select %p579_p3, 1, 0 }
  0x2b   : > { %p404_p9 = scmp.ne.s32.totalorder %s588_s25, %s403_s26  ;;  %s408_s3 = scalar_lea.hbm %s641_s1, 256 }
  0x2c   : > { %p409_p5 = scmp.lt.s32.totalorder %s588_s25, %s641_s1  ;;  %p410_p6 = scmp.lt.s32.totalorder %s408_s3, %s403_s26 }
  0x2d   : > { %p406_p10 = pnand %p404_p9, %p377_p12 }
  0x2e   : > { %p411_p11 = por %p410_p6, %p409_p5 }
  0x2f   : > { %p407_p4 = pneg %p406_p10 }
  0x31   : > { %p412_p13 = pnand %p411_p11, %p407_p4 }
  0x33   : > { %415 = shalt.err (!%p412_p13)
}
  0x34   : > { %s416_s20 = scalar_lea.vmem %s144_s30, 128  ;;  %s472_s19 = smov [#allocation4]  }
  0x35   : > { %p417_p1 = scmp.ne.s32.totalorder %s144_s30, %s416_s20  ;;  %s421_s5 = sshll.u32 %s472_s19, 4  ;;  %s422_s5 = int_to_ptr.vmem [resolvable:$false] %s421_s5 }
  0x36   : > { %s423_s6 = scalar_lea.vmem %s422_s5, 256  ;;  %p424_p9 = scmp.lt.s32.totalorder %s144_s30, %s422_s5 }
  0x37   : > { %p419_p0 = pnand %p417_p1, %p377_p12  ;;  %p425_p10 = scmp.lt.s32.totalorder %s423_s6, %s416_s20 }
  0x39   : > { %p420_p2 = pneg %p419_p0  ;;  %p426_p7 = por %p425_p10, %p424_p9 }
  0x3b   : > { %p427_p3 = pnand %p426_p7, %p420_p2 }
  0x3d   : > { %430 = shalt.err (!%p427_p3)
}
  0x3e   : > { %333 = dma.hbm_to_vmem [thread:$0]  (!%p544_p8), %s588_s25, 128, %s144_s30, %s133_s24  }
  0x3f   : > { %p649_p4 = scmp.ne.s32.totalorder %s648_s16, 0 }
  0x40   : > { %s154_s7 = sand.u32 (!%p649_p4), 1, %s461_s10   ;;  %p650_p12 = scmp.ne.s32.totalorder (!%p649_p4), %s644_s18, 0 }
  0x41   : > { %152 = sbr.rel (%p649_p4) target bundleno = 391 (0x187), region = 28  ;;  %s318_s8 = sshll.u32 (!%p649_p4), %s154_s7, 3 }
  0x42   : > { %s155_s9 = scalar_lea.sflag (!%p649_p4), [#allocation3], %s154_s7  ;;  %s158_s15 = scalar_lea.vmem (!%p649_p4), [#allocation2], %s318_s8 }
  0x46   : > { %448 = dma.done.wait (%p650_p12), %s155_s9, 128  }
  0x47   : > { %450 = vsyncadd (%p650_p12), %s155_s9, 4294967168  ;;  %s164_s22 = scalar_lea.sflag [#allocation5], %s154_s7  ;;  %s167_s23 = scalar_lea.vmem [#allocation4], %s318_s8 }
  0x48   : > { %452 = dma.done.wait (%p650_p12), %s164_s22, 128  }
  0x49   : > { %454 = vsyncadd (%p650_p12), %s164_s22, 4294967168  ;;  %v196_v0 = vld [vmem:[%s158_s15] sm:$0xff]  ;;  %v197_v1 = vld [vmem:[%s167_s23] sm:$0xff]  ;;  %p192_p7 = scmp.lt.s32.totalorder %s507_s13, 1  ;;  %vm220_vm0 = vcmask 7168  }
  0x4a   : > { %198 = vmax.xlane.f32.xlu0 %v196_v0 }
  0x4b   : > { %s656_s13 = smov (!%p192_p7, %s507_s13), 1 }
  0x4c   : > { %s320_s18 = sshll.u32 %s656_s13, 3 }
  0x4d   : > { %s195_s25 = scalar_lea.vmem %s642_s2, %s320_s18 }
  0x4e   : > { %201 = vmax.xlane.f32.xlu0 %v197_v1 }
  0xd3   : > { %v199_v2 = vpop.xlane.xlu0 %198 }
  0xd4   : > { %v200_v3 = vsub.f32 %v196_v0, %v199_v2 }
  0xd6   : > { %v206_v4 = vmul.f32 1.442695, %v200_v3 }
  0xd7   : > { %v202_v5 = vpop.xlane.xlu0 %201 }
  0xd8   : > { %v203_v6 = vsub.f32 %v197_v1, %v202_v5  ;;  %367 = vpow2.f32 %v206_v4 }
  0xda   : > { %v204_v7 = vmul.f32 1.442695, %v203_v6 }
  0xdc   : > { %369 = vpow2.f32 %v204_v7 }
  0xe5   : > { %v368_v8 = vpop.eup %367 }
  0xe6   : > { %208 = vadd.xlane.f32.xlu1 %v368_v8 }
  0xe9   : > { %v370_v9 = vpop.eup %369 }
  0xea   : > { %212 = vadd.xlane.f32.xlu1 %v370_v9  ;;  %v214_v10 = vmul.f32 %v370_v9, %v200_v3 }
  0xec   : > { %215 = vadd.xlane.f32.xlu0 %v214_v10 }
 0x16f   : > { %v209_v11 = vpop.xlane.xlu1 %208 }
 0x170   : > { %371 = vlog2.f32 %v209_v11 }
 0x173   : > { %v213_v12 = vpop.xlane.xlu1 %212 }
 0x174   : > { %373 = vrcp.f32 %v213_v12 }
 0x175   : > { %v216_v15 = vpop.xlane.xlu0 %215 }
 0x17d   : > { %v372_v13 = vpop.eup %371 }
 0x17e   : > { %v211_v16 = vmul.f32 0.6931472, %v372_v13 }
 0x181   : > { %v374_v14 = vpop.eup %373 }
 0x182   : > { %v218_v17 = vmul.f32 %v374_v14, %v216_v15 }
 0x184   : > { %v219_v18 = vsub.f32 %v218_v17, %v211_v16 }
 0x186   : > { %221 = vst.msk [vmem:[%s195_s25] sm:$0xff] %vm220_vm0, %v219_v18 }
 0x187 PF: > { %p15_p8 = scmp.ge.s32.totalorder %s510_s14, 4   ;;  %s651_s9 = smov %s461_s10 }
 0x188   : > { %s652_s10 = smov %s465_s11  ;;  %s653_s11 = smov %s520_s17 }
 0x189   : > { %s654_s12 = smov %s510_s14  ;;  %17 = sbr.rel (!%p15_p8) target bundleno = 5 (0x5), region = 81 }
 0x18e   :  { %241 = vsyncpa [#allocation3], 1 }
 0x18f   :  { %243 = vsyncpa [#allocation3 + $0x1], 1 }
 0x190   :  { %244 = vsyncpa [#allocation5], 1 }
 0x191   :  { %246 = vsyncpa [#allocation5 + $0x1], 1 }

</bundles_post_ra>
